<compile_context>
chip_gen: v7x
topology: tpu7x:2x2x1
jax: 0.10.0
libtpu: 0.0.40
codegen_flags: <defaults>
</compile_context>

<pallas_src>
import jax
import jax.numpy as jnp
from jax.experimental import pallas as pl
from jax.experimental.pallas import tpu as pltpu


# -----------------------------------------------------------------------------
# One-time weight transform: 3x3 conv -> banded matmul weights.
# conv3x3_samepad(x)[h, w*Cout+co] == sum_kh ( XP[h+kh] @ M[kh] )[w*Cout+co]
# where XP is the image with one zero row above/below and each row flattened
# with lane index w*Cin + ci.  Out-of-range W taps are zero entries of M.
# -----------------------------------------------------------------------------
def _banded_conv_weights(wk, W):
    # wk: (3, 3, Cin, Cout)  ->  (3, W*Cin, W*Cout)
    _, _, Cin, Cout = wk.shape
    wp = jnp.arange(W)[:, None]              # source column (W, 1)
    w = jnp.arange(W)[None, :]               # output column (1, W)
    kw = wp - w + 1                          # tap index, (W, W)
    valid = (kw >= 0) & (kw <= 2)
    g = wk[:, jnp.clip(kw, 0, 2)]            # (3, W, W, Cin, Cout)
    g = jnp.where(valid[None, :, :, None, None], g, 0.0)
    m = jnp.transpose(g, (0, 1, 3, 2, 4))    # (kh, wp, Cin, w, Cout)
    return m.reshape(3, W * Cin, W * Cout)


# -----------------------------------------------------------------------------
# Fused kernel: one block of Nb images per grid step.
#   inputs : x rows (Nb,H,W*Cin), valid-row mask (R,1), banded conv weights,
#            pre-broadcast biases, folded head matrix/bias (lane-padded)
#   outputs: fma (Nb,H,W*Cfeat) lane-dense, head logits (Nb,nm_pad) lane-dense
#   scratch: stacked row-padded slabs xp/hp in the MXU operand dtype
# -----------------------------------------------------------------------------
def _fused_forward_kernel(x_ref, mask_ref, m1_ref, b1_ref, m2_ref, b2_ref,
                          wh_ref, bh_ref, fma_ref, out_ref, xp_ref, hp_ref):
    Nb, H = x_ref.shape[0], x_ref.shape[1]
    P = H + 2                    # padded rows per image
    R = Nb * P - 2               # stacked MXU M dimension
    cdt = xp_ref.dtype           # MXU operand dtype (f32 or bf16)

    # --- build the stacked, row-padded input slab (cast once, per image) ----
    zx = jnp.zeros((1, xp_ref.shape[1]), cdt)
    for i in range(Nb):
        base = i * P
        xp_ref[pl.ds(base, 1), :] = zx
        xp_ref[pl.ds(base + 1, H), :] = x_ref[i].astype(cdt)
        xp_ref[pl.ds(base + H + 1, 1), :] = zx

    def banded_conv(src_ref, m_ref, b_ref):
        # 3 MXU matmuls over the whole stack, f32 accumulation
        acc = jnp.dot(src_ref[pl.ds(0, R), :], m_ref[0],
                      preferred_element_type=jnp.float32)
        for kh in (1, 2):
            acc = acc + jnp.dot(src_ref[pl.ds(kh, R), :], m_ref[kh],
                                preferred_element_type=jnp.float32)
        return acc + b_ref[...]

    # conv1 + ReLU over the stacked slab.  mask zeroes the 2 junk rows at each
    # image boundary; those rows double as conv2's zero halos, so this mask is
    # required for correctness (not just cosmetics).
    h_stack = jnp.maximum(banded_conv(xp_ref, m1_ref, b1_ref), 0.0) * mask_ref[...]

    # stacked, row-padded h slab for conv2 (cast once on write)
    zh = jnp.zeros((1, hp_ref.shape[1]), cdt)
    hp_ref[pl.ds(0, 1), :] = zh
    hp_ref[pl.ds(1, R), :] = h_stack.astype(cdt)
    hp_ref[pl.ds(R + 1, 1), :] = zh

    # conv2 -> stacked fma (forward-hook capture); junk rows discarded below.
    fma_stack = banded_conv(hp_ref, m2_ref, b2_ref)

    # per-image: store fma lane-dense, accumulate ReLU column-sums for the
    # folded head (ReLU -> GAP -> fc -> class_mapping == colsum @ wh + bh).
    colsums = []
    for i in range(Nb):
        fi = fma_stack[i * P:i * P + H]                       # valid rows only
        fma_ref[i] = fi.astype(fma_ref.dtype)
        colsums.append(jnp.sum(jnp.maximum(fi, 0.0), axis=0, keepdims=True))
    colsum = jnp.concatenate(colsums, axis=0) if Nb > 1 else colsums[0]
    head = jnp.dot(colsum.astype(wh_ref.dtype), wh_ref[...],
                   preferred_element_type=jnp.float32) + bh_ref[...]
    out_ref[...] = head.astype(out_ref.dtype)


# -----------------------------------------------------------------------------
# XAI_model_wrapper forward: returns (class_mapped_logits, fma[NHWC])
# -----------------------------------------------------------------------------
def xai_model_wrapper_forward(x_nchw, params, *, use_bf16=False,
                              images_per_step=None):
    N, Cin, H, W = x_nchw.shape
    Cmid = params["conv1_w"].shape[-1]
    Cfeat = params["conv2_w"].shape[-1]
    nm = params["cm_w"].shape[-1]
    nm_pad = ((nm + 127) // 128) * 128         # lane-dense head output
    cdt = jnp.bfloat16 if use_bf16 else jnp.float32   # MXU operand dtype

    Nb = N if images_per_step is None else images_per_step
    assert N % Nb == 0, "batch must divide evenly into image blocks"
    assert Nb == N or Nb % 8 == 0, "image block must be N or a multiple of 8"
    P, R = H + 2, Nb * (H + 2) - 2

    # layout: NCHW -> per-image rows (H, W*Cin); channels packed onto lanes.
    x_pk = jnp.transpose(x_nchw, (0, 2, 3, 1)).reshape(N, H, W * Cin)

    # valid-row mask for the stacked slab (junk/halo rows at image boundaries)
    rows = jnp.arange(R)
    mask = ((rows % P) < H).astype(jnp.float32).reshape(R, 1)

    # one-time (tiny) weight transforms
    m1 = _banded_conv_weights(params["conv1_w"], W).astype(cdt)   # (3,W*Cin,W*Cmid)
    m2 = _banded_conv_weights(params["conv2_w"], W).astype(cdt)   # (3,W*Cmid,W*Cf)
    b1 = jnp.tile(params["conv1_b"], W).reshape(1, W * Cmid).astype(jnp.float32)
    b2 = jnp.tile(params["conv2_b"], W).reshape(1, W * Cfeat).astype(jnp.float32)
    a = (params["fc_w"] @ params["cm_w"]) / float(H * W)          # (Cfeat, nm)
    wh = jnp.pad(jnp.tile(a, (W, 1)), ((0, 0), (0, nm_pad - nm))).astype(cdt)
    bh = jnp.pad((params["fc_b"] @ params["cm_w"]).reshape(1, nm),
                 ((0, 0), (0, nm_pad - nm))).astype(jnp.float32)

    fma_pk, head_pad = pl.pallas_call(
        _fused_forward_kernel,
        out_shape=(
            jax.ShapeDtypeStruct((N, H, W * Cfeat), jnp.float32),   # fma, lane-dense
            jax.ShapeDtypeStruct((N, nm_pad), jnp.float32),         # head, lane-dense
        ),
        grid_spec=pltpu.PrefetchScalarGridSpec(
            num_scalar_prefetch=0,
            grid=(N // Nb,),
            in_specs=[
                pl.BlockSpec((Nb, H, W * Cin), lambda n: (n, 0, 0)),
                pl.BlockSpec((R, 1), lambda n: (0, 0)),
                pl.BlockSpec((3, W * Cin, W * Cmid), lambda n: (0, 0, 0)),
                pl.BlockSpec((1, W * Cmid), lambda n: (0, 0)),
                pl.BlockSpec((3, W * Cmid, W * Cfeat), lambda n: (0, 0, 0)),
                pl.BlockSpec((1, W * Cfeat), lambda n: (0, 0)),
                pl.BlockSpec((W * Cfeat, nm_pad), lambda n: (0, 0)),
                pl.BlockSpec((1, nm_pad), lambda n: (0, 0)),
            ],
            out_specs=(
                pl.BlockSpec((Nb, H, W * Cfeat), lambda n: (n, 0, 0)),
                pl.BlockSpec((Nb, nm_pad), lambda n: (n, 0)),
            ),
            scratch_shapes=[
                pltpu.VMEM((Nb * P, W * Cin), cdt),    # stacked row-padded x
                pltpu.VMEM((Nb * P, W * Cmid), cdt),   # stacked row-padded h
            ],
        ),
        compiler_params=pltpu.CompilerParams(
            dimension_semantics=("parallel",)),   # batch blocks across TCs (v7x)
    )(x_pk, mask, m1, b1, m2, b2, wh, bh)

    fma = fma_pk.reshape(N, H, W, Cfeat)          # NHWC view of the hook tensor
    return head_pad[:, :nm], fma


# Pure-JAX reference (same math) for a correctness check.
def _reference_forward(x_nchw, params):
    x = jnp.transpose(x_nchw, (0, 2, 3, 1))

    def conv(x, w, b):
        xp = jnp.pad(x, ((0, 0), (1, 1), (1, 1), (0, 0)))
        H, W = x.shape[1], x.shape[2]
        acc = jnp.zeros(x.shape[:3] + (w.shape[-1],), jnp.float32)
        for kh in range(3):
            for kw in range(3):
                acc = acc + jnp.einsum("nhwc,co->nhwo",
                                       xp[:, kh:kh + H, kw:kw + W, :], w[kh, kw])
        return acc + b[None, None, None, :]

    h = jnp.maximum(conv(x, params["conv1_w"], params["conv1_b"]), 0.0)
    fma = conv(h, params["conv2_w"], params["conv2_b"])
    pooled = jnp.mean(jnp.maximum(fma, 0.0), axis=(1, 2))
    logits = pooled @ params["fc_w"] + params["fc_b"]
    return logits @ params["cm_w"], fma


if __name__ == "__main__":
    key = jax.random.PRNGKey(0)
    N, Cin, H, W = 2, 4, 16, 16
    Cmid, Cfeat = 8, 8
    num_classes, num_mapped = 10, 10

    ks = jax.random.split(key, 8)
    params = {
        "conv1_w": jax.random.normal(ks[0], (3, 3, Cin, Cmid), jnp.float32) * 0.1,
        "conv1_b": jax.random.normal(ks[1], (Cmid,), jnp.float32) * 0.1,
        "conv2_w": jax.random.normal(ks[2], (3, 3, Cmid, Cfeat), jnp.float32) * 0.1,
        "conv2_b": jax.random.normal(ks[3], (Cfeat,), jnp.float32) * 0.1,
        "fc_w": jax.random.normal(ks[4], (Cfeat, num_classes), jnp.float32) * 0.1,
        "fc_b": jax.random.normal(ks[5], (num_classes,), jnp.float32) * 0.1,
        "cm_w": jax.random.normal(ks[6], (num_classes, num_mapped), jnp.float32) * 0.1,
    }
    x = jax.random.normal(ks[7], (N, Cin, H, W), jnp.float32)

    ref_out, ref_fma = _reference_forward(x, params)

    # f32 path (exact module semantics; whole batch in one grid step)
    out, fma = xai_model_wrapper_forward(x, params)
    jax.block_until_ready(out)
    jax.block_until_ready(fma)
    assert jnp.allclose(out, ref_out, atol=1e-3, rtol=1e-3)
    assert jnp.allclose(fma, ref_fma, atol=1e-3, rtol=1e-3)

    # bf16-operand path (MXU fast path on v5e/v6e/v7x; f32 accumulation kept).
    # Note: bf16 also rounds the captured fma hook tensor (documented tolerance).
    out_bf, fma_bf = xai_model_wrapper_forward(x, params, use_bf16=True)
    jax.block_until_ready(out_bf)
    jax.block_until_ready(fma_bf)
    assert jnp.allclose(out_bf, ref_out, atol=5e-2, rtol=0.0)
    assert jnp.allclose(fma_bf, ref_fma, atol=5e-2, rtol=0.0)

    # TODO(synk): backward-hook ("fmg") capture / get_fmg_weights requires a
    # custom VJP over this kernel; only the forward pass is implemented here.
    print("KERNEL_OK")
</pallas_src>

<mosaic_0001>
module attributes {stable_mosaic.version = 11 : i64} {
  func.func @_fused_forward_kernel(%arg0: i32, %arg1: memref<2x16x64xf32, #tpu.memory_space<vmem>>, %arg2: memref<34x1xf32, #tpu.memory_space<vmem>>, %arg3: memref<3x64x128xf32, #tpu.memory_space<vmem>>, %arg4: memref<1x128xf32, #tpu.memory_space<vmem>>, %arg5: memref<3x128x128xf32, #tpu.memory_space<vmem>>, %arg6: memref<1x128xf32, #tpu.memory_space<vmem>>, %arg7: memref<128x128xf32, #tpu.memory_space<vmem>>, %arg8: memref<1x128xf32, #tpu.memory_space<vmem>>, %arg9: memref<2x16x128xf32, #tpu.memory_space<vmem>>, %arg10: memref<2x128xf32, #tpu.memory_space<vmem>>, %arg11: memref<36x64xf32, #tpu.memory_space<vmem>>, %arg12: memref<36x128xf32, #tpu.memory_space<vmem>>) attributes {dimension_semantics = [#tpu.dimension_semantics<parallel>], iteration_bounds = array<i64: 1>, scalar_prefetch = 0 : i64, scratch_operands = 2 : i64, tpu.core_type = #tpu.core_type<tc>, window_params = [{transform_indices = @transform_0, window_bounds = array<i64: 2, 16, 64>}, {pipeline_mode = #tpu.pipeline_mode<synchronous>, transform_indices = @transform_1, window_bounds = array<i64: 34, 1>}, {pipeline_mode = #tpu.pipeline_mode<synchronous>, transform_indices = @transform_2, window_bounds = array<i64: 3, 64, 128>}, {pipeline_mode = #tpu.pipeline_mode<synchronous>, transform_indices = @transform_3, window_bounds = array<i64: 1, 128>}, {pipeline_mode = #tpu.pipeline_mode<synchronous>, transform_indices = @transform_4, window_bounds = array<i64: 3, 128, 128>}, {pipeline_mode = #tpu.pipeline_mode<synchronous>, transform_indices = @transform_5, window_bounds = array<i64: 1, 128>}, {pipeline_mode = #tpu.pipeline_mode<synchronous>, transform_indices = @transform_6, window_bounds = array<i64: 128, 128>}, {pipeline_mode = #tpu.pipeline_mode<synchronous>, transform_indices = @transform_7, window_bounds = array<i64: 1, 128>}, {transform_indices = @transform_8, window_bounds = array<i64: 2, 16, 128>}, {transform_indices = @transform_9, window_bounds = array<i64: 2, 128>}]} {
    %cst = arith.constant 0.000000e+00 : f32
    %0 = vector.broadcast %cst : f32 to vector<1x64xf32>
    %c0 = arith.constant 0 : index
    %c0_0 = arith.constant 0 : index
    %1 = vector.load %arg11[%c0, %c0_0] : memref<36x64xf32, #tpu.memory_space<vmem>>, vector<1x64xf32>
    tpu.vector_store %arg11[%c0, %c0_0], %0 {strides = array<i32>} : memref<36x64xf32, #tpu.memory_space<vmem>>, vector<1x64xf32>,
    %c0_1 = arith.constant 0 : index
    %c0_2 = arith.constant 0 : index
    %c0_3 = arith.constant 0 : index
    %2 = vector.load %arg1[%c0_1, %c0_2, %c0_3] : memref<2x16x64xf32, #tpu.memory_space<vmem>>, vector<1x16x64xf32>
    %3 = vector.shape_cast %2 : vector<1x16x64xf32> to vector<16x64xf32>
    %c1 = arith.constant 1 : index
    %c0_4 = arith.constant 0 : index
    %4 = vector.load %arg11[%c1, %c0_4] : memref<36x64xf32, #tpu.memory_space<vmem>>, vector<16x64xf32>
    tpu.vector_store %arg11[%c1, %c0_4], %3 {strides = array<i32>} : memref<36x64xf32, #tpu.memory_space<vmem>>, vector<16x64xf32>,
    %c17 = arith.constant 17 : index
    %c0_5 = arith.constant 0 : index
    %5 = vector.load %arg11[%c17, %c0_5] : memref<36x64xf32, #tpu.memory_space<vmem>>, vector<1x64xf32>
    tpu.vector_store %arg11[%c17, %c0_5], %0 {strides = array<i32>} : memref<36x64xf32, #tpu.memory_space<vmem>>, vector<1x64xf32>,
    %c18 = arith.constant 18 : index
    %c0_6 = arith.constant 0 : index
    %6 = vector.load %arg11[%c18, %c0_6] : memref<36x64xf32, #tpu.memory_space<vmem>>, vector<1x64xf32>
    tpu.vector_store %arg11[%c18, %c0_6], %0 {strides = array<i32>} : memref<36x64xf32, #tpu.memory_space<vmem>>, vector<1x64xf32>,
    %c1_7 = arith.constant 1 : index
    %c0_8 = arith.constant 0 : index
    %c0_9 = arith.constant 0 : index
    %7 = vector.load %arg1[%c1_7, %c0_8, %c0_9] : memref<2x16x64xf32, #tpu.memory_space<vmem>>, vector<1x16x64xf32>
    %8 = vector.shape_cast %7 : vector<1x16x64xf32> to vector<16x64xf32>
    %c19 = arith.constant 19 : index
    %c0_10 = arith.constant 0 : index
    %9 = vector.load %arg11[%c19, %c0_10] : memref<36x64xf32, #tpu.memory_space<vmem>>, vector<16x64xf32>
    tpu.vector_store %arg11[%c19, %c0_10], %8 {strides = array<i32>} : memref<36x64xf32, #tpu.memory_space<vmem>>, vector<16x64xf32>,
    %c35 = arith.constant 35 : index
    %c0_11 = arith.constant 0 : index
    %10 = vector.load %arg11[%c35, %c0_11] : memref<36x64xf32, #tpu.memory_space<vmem>>, vector<1x64xf32>
    tpu.vector_store %arg11[%c35, %c0_11], %0 {strides = array<i32>} : memref<36x64xf32, #tpu.memory_space<vmem>>, vector<1x64xf32>,
    %c0_12 = arith.constant 0 : index
    %c0_13 = arith.constant 0 : index
    %11 = vector.load %arg11[%c0_12, %c0_13] : memref<36x64xf32, #tpu.memory_space<vmem>>, vector<34x64xf32>
    %c0_14 = arith.constant 0 : index
    %c0_15 = arith.constant 0 : index
    %c0_16 = arith.constant 0 : index
    %12 = vector.load %arg3[%c0_14, %c0_15, %c0_16] : memref<3x64x128xf32, #tpu.memory_space<vmem>>, vector<1x64x128xf32>
    %13 = vector.shape_cast %12 : vector<1x64x128xf32> to vector<64x128xf32>
    %cst_17 = arith.constant dense<0.000000e+00> : vector<34x128xf32>
    %14 = tpu.matmul %11, %13, %cst_17 {dimension_numbers = #tpu.dot_dimension_numbers<[1], [0], [0], [1], [0, 0, 1, 1], [], []>} : vector<34x64xf32>, vector<64x128xf32>, vector<34x128xf32> -> vector<34x128xf32>
    %c1_18 = arith.constant 1 : index
    %c0_19 = arith.constant 0 : index
    %15 = vector.load %arg11[%c1_18, %c0_19] : memref<36x64xf32, #tpu.memory_space<vmem>>, vector<34x64xf32>
    %c1_20 = arith.constant 1 : index
    %c0_21 = arith.constant 0 : index
    %c0_22 = arith.constant 0 : index
    %16 = vector.load %arg3[%c1_20, %c0_21, %c0_22] : memref<3x64x128xf32, #tpu.memory_space<vmem>>, vector<1x64x128xf32>
    %17 = vector.shape_cast %16 : vector<1x64x128xf32> to vector<64x128xf32>
    %cst_23 = arith.constant dense<0.000000e+00> : vector<34x128xf32>
    %18 = tpu.matmul %15, %17, %cst_23 {dimension_numbers = #tpu.dot_dimension_numbers<[1], [0], [0], [1], [0, 0, 1, 1], [], []>} : vector<34x64xf32>, vector<64x128xf32>, vector<34x128xf32> -> vector<34x128xf32>
    %19 = arith.addf %14, %18 : vector<34x128xf32>
    %c2 = arith.constant 2 : index
    %c0_24 = arith.constant 0 : index
    %20 = vector.load %arg11[%c2, %c0_24] : memref<36x64xf32, #tpu.memory_space<vmem>>, vector<34x64xf32>
    %c2_25 = arith.constant 2 : index
    %c0_26 = arith.constant 0 : index
    %c0_27 = arith.constant 0 : index
    %21 = vector.load %arg3[%c2_25, %c0_26, %c0_27] : memref<3x64x128xf32, #tpu.memory_space<vmem>>, vector<1x64x128xf32>
    %22 = vector.shape_cast %21 : vector<1x64x128xf32> to vector<64x128xf32>
    %cst_28 = arith.constant dense<0.000000e+00> : vector<34x128xf32>
    %23 = tpu.matmul %20, %22, %cst_28 {dimension_numbers = #tpu.dot_dimension_numbers<[1], [0], [0], [1], [0, 0, 1, 1], [], []>} : vector<34x64xf32>, vector<64x128xf32>, vector<34x128xf32> -> vector<34x128xf32>
    %24 = arith.addf %19, %23 : vector<34x128xf32>
    %c0_29 = arith.constant 0 : index
    %c0_30 = arith.constant 0 : index
    %25 = vector.load %arg4[%c0_29, %c0_30] : memref<1x128xf32, #tpu.memory_space<vmem>>, vector<1x128xf32>
    %26 = vector.broadcast %25 : vector<1x128xf32> to vector<34x128xf32>
    %27 = arith.addf %24, %26 : vector<34x128xf32>
    %cst_31 = arith.constant 0.000000e+00 : f32
    %28 = vector.broadcast %cst_31 : f32 to vector<34x128xf32>
    %29 = arith.maximumf %27, %28 : vector<34x128xf32>
    %c0_32 = arith.constant 0 : index
    %c0_33 = arith.constant 0 : index
    %30 = vector.load %arg2[%c0_32, %c0_33] : memref<34x1xf32, #tpu.memory_space<vmem>>, vector<34x1xf32>
    %31 = vector.broadcast %30 : vector<34x1xf32> to vector<34x128xf32>
    %32 = arith.mulf %29, %31 : vector<34x128xf32>
    %cst_34 = arith.constant 0.000000e+00 : f32
    %33 = vector.broadcast %cst_34 : f32 to vector<1x128xf32>
    %c0_35 = arith.constant 0 : index
    %c0_36 = arith.constant 0 : index
    %34 = vector.load %arg12[%c0_35, %c0_36] : memref<36x128xf32, #tpu.memory_space<vmem>>, vector<1x128xf32>
    tpu.vector_store %arg12[%c0_35, %c0_36], %33 {strides = array<i32>} : memref<36x128xf32, #tpu.memory_space<vmem>>, vector<1x128xf32>,
    %c1_37 = arith.constant 1 : index
    %c0_38 = arith.constant 0 : index
    %35 = vector.load %arg12[%c1_37, %c0_38] : memref<36x128xf32, #tpu.memory_space<vmem>>, vector<34x128xf32>
    tpu.vector_store %arg12[%c1_37, %c0_38], %32 {strides = array<i32>} : memref<36x128xf32, #tpu.memory_space<vmem>>, vector<34x128xf32>,
    %c35_39 = arith.constant 35 : index
    %c0_40 = arith.constant 0 : index
    %36 = vector.load %arg12[%c35_39, %c0_40] : memref<36x128xf32, #tpu.memory_space<vmem>>, vector<1x128xf32>
    tpu.vector_store %arg12[%c35_39, %c0_40], %33 {strides = array<i32>} : memref<36x128xf32, #tpu.memory_space<vmem>>, vector<1x128xf32>,
    %c0_41 = arith.constant 0 : index
    %c0_42 = arith.constant 0 : index
    %37 = vector.load %arg12[%c0_41, %c0_42] : memref<36x128xf32, #tpu.memory_space<vmem>>, vector<34x128xf32>
    %c0_43 = arith.constant 0 : index
    %c0_44 = arith.constant 0 : index
    %c0_45 = arith.constant 0 : index
    %38 = vector.load %arg5[%c0_43, %c0_44, %c0_45] : memref<3x128x128xf32, #tpu.memory_space<vmem>>, vector<1x128x128xf32>
    %39 = vector.shape_cast %38 : vector<1x128x128xf32> to vector<128x128xf32>
    %cst_46 = arith.constant dense<0.000000e+00> : vector<34x128xf32>
    %40 = tpu.matmul %37, %39, %cst_46 {dimension_numbers = #tpu.dot_dimension_numbers<[1], [0], [0], [1], [0, 0, 1, 1], [], []>} : vector<34x128xf32>, vector<128x128xf32>, vector<34x128xf32> -> vector<34x128xf32>
    %c1_47 = arith.constant 1 : index
    %c0_48 = arith.constant 0 : index
    %41 = vector.load %arg12[%c1_47, %c0_48] : memref<36x128xf32, #tpu.memory_space<vmem>>, vector<34x128xf32>
    %c1_49 = arith.constant 1 : index
    %c0_50 = arith.constant 0 : index
    %c0_51 = arith.constant 0 : index
    %42 = vector.load %arg5[%c1_49, %c0_50, %c0_51] : memref<3x128x128xf32, #tpu.memory_space<vmem>>, vector<1x128x128xf32>
    %43 = vector.shape_cast %42 : vector<1x128x128xf32> to vector<128x128xf32>
    %cst_52 = arith.constant dense<0.000000e+00> : vector<34x128xf32>
    %44 = tpu.matmul %41, %43, %cst_52 {dimension_numbers = #tpu.dot_dimension_numbers<[1], [0], [0], [1], [0, 0, 1, 1], [], []>} : vector<34x128xf32>, vector<128x128xf32>, vector<34x128xf32> -> vector<34x128xf32>
    %45 = arith.addf %40, %44 : vector<34x128xf32>
    %c2_53 = arith.constant 2 : index
    %c0_54 = arith.constant 0 : index
    %46 = vector.load %arg12[%c2_53, %c0_54] : memref<36x128xf32, #tpu.memory_space<vmem>>, vector<34x128xf32>
    %c2_55 = arith.constant 2 : index
    %c0_56 = arith.constant 0 : index
    %c0_57 = arith.constant 0 : index
    %47 = vector.load %arg5[%c2_55, %c0_56, %c0_57] : memref<3x128x128xf32, #tpu.memory_space<vmem>>, vector<1x128x128xf32>
    %48 = vector.shape_cast %47 : vector<1x128x128xf32> to vector<128x128xf32>
    %cst_58 = arith.constant dense<0.000000e+00> : vector<34x128xf32>
    %49 = tpu.matmul %46, %48, %cst_58 {dimension_numbers = #tpu.dot_dimension_numbers<[1], [0], [0], [1], [0, 0, 1, 1], [], []>} : vector<34x128xf32>, vector<128x128xf32>, vector<34x128xf32> -> vector<34x128xf32>
    %50 = arith.addf %45, %49 : vector<34x128xf32>
    %c0_59 = arith.constant 0 : index
    %c0_60 = arith.constant 0 : index
    %51 = vector.load %arg6[%c0_59, %c0_60] : memref<1x128xf32, #tpu.memory_space<vmem>>, vector<1x128xf32>
    %52 = vector.broadcast %51 : vector<1x128xf32> to vector<34x128xf32>
    %53 = arith.addf %50, %52 : vector<34x128xf32>
    %54 = vector.extract_strided_slice %53 {offsets = [0, 0], sizes = [16, 128], strides = [1, 1]} : vector<34x128xf32> to vector<16x128xf32>
    %c0_61 = arith.constant 0 : index
    %c0_62 = arith.constant 0 : index
    %c0_63 = arith.constant 0 : index
    %55 = vector.load %arg9[%c0_61, %c0_62, %c0_63] : memref<2x16x128xf32, #tpu.memory_space<vmem>>, vector<1x16x128xf32>
    %56 = vector.shape_cast %55 : vector<1x16x128xf32> to vector<16x128xf32>
    %57 = vector.shape_cast %54 : vector<16x128xf32> to vector<1x16x128xf32>
    tpu.vector_store %arg9[%c0_61, %c0_62, %c0_63], %57 {strides = array<i32>} : memref<2x16x128xf32, #tpu.memory_space<vmem>>, vector<1x16x128xf32>,
    %cst_64 = arith.constant 0.000000e+00 : f32
    %58 = vector.broadcast %cst_64 : f32 to vector<16x128xf32>
    %59 = arith.maximumf %54, %58 : vector<16x128xf32>
    %cst_65 = arith.constant dense<0.000000e+00> : vector<128xf32>
    %60 = vector.multi_reduction <add>, %59, %cst_65 [0] : vector<16x128xf32> to vector<128xf32>
    %61 = vector.shape_cast %60 : vector<128xf32> to vector<1x128xf32>
    %62 = vector.extract_strided_slice %53 {offsets = [18, 0], sizes = [16, 128], strides = [1, 1]} : vector<34x128xf32> to vector<16x128xf32>
    %c1_66 = arith.constant 1 : index
    %c0_67 = arith.constant 0 : index
    %c0_68 = arith.constant 0 : index
    %63 = vector.load %arg9[%c1_66, %c0_67, %c0_68] : memref<2x16x128xf32, #tpu.memory_space<vmem>>, vector<1x16x128xf32>
    %64 = vector.shape_cast %63 : vector<1x16x128xf32> to vector<16x128xf32>
    %65 = vector.shape_cast %62 : vector<16x128xf32> to vector<1x16x128xf32>
    tpu.vector_store %arg9[%c1_66, %c0_67, %c0_68], %65 {strides = array<i32>} : memref<2x16x128xf32, #tpu.memory_space<vmem>>, vector<1x16x128xf32>,
    %cst_69 = arith.constant 0.000000e+00 : f32
    %66 = vector.broadcast %cst_69 : f32 to vector<16x128xf32>
    %67 = arith.maximumf %62, %66 : vector<16x128xf32>
    %cst_70 = arith.constant dense<0.000000e+00> : vector<128xf32>
    %68 = vector.multi_reduction <add>, %67, %cst_70 [0] : vector<16x128xf32> to vector<128xf32>
    %69 = vector.shape_cast %68 : vector<128xf32> to vector<1x128xf32>
    %70 = tpu.concatenate %61, %69 in 0 : vector<1x128xf32>, vector<1x128xf32> -> vector<2x128xf32>
    %c0_71 = arith.constant 0 : index
    %c0_72 = arith.constant 0 : index
    %71 = vector.load %arg7[%c0_71, %c0_72] : memref<128x128xf32, #tpu.memory_space<vmem>>, vector<128x128xf32>
    %cst_73 = arith.constant dense<0.000000e+00> : vector<2x128xf32>
    %72 = tpu.matmul %70, %71, %cst_73 {dimension_numbers = #tpu.dot_dimension_numbers<[1], [0], [0], [1], [0, 0, 1, 1], [], []>} : vector<2x128xf32>, vector<128x128xf32>, vector<2x128xf32> -> vector<2x128xf32>
    %c0_74 = arith.constant 0 : index
    %c0_75 = arith.constant 0 : index
    %73 = vector.load %arg8[%c0_74, %c0_75] : memref<1x128xf32, #tpu.memory_space<vmem>>, vector<1x128xf32>
    %74 = vector.broadcast %73 : vector<1x128xf32> to vector<2x128xf32>
    %75 = arith.addf %72, %74 : vector<2x128xf32>
    %c0_76 = arith.constant 0 : index
    %c0_77 = arith.constant 0 : index
    %76 = vector.load %arg10[%c0_76, %c0_77] : memref<2x128xf32, #tpu.memory_space<vmem>>, vector<2x128xf32>
    tpu.vector_store %arg10[%c0_76, %c0_77], %75 {strides = array<i32>} : memref<2x128xf32, #tpu.memory_space<vmem>>, vector<2x128xf32>,
    return
  }
  func.func @transform_0(%arg0: i32) -> (i32, i32, i32) {
    %c0_i32 = arith.constant 0 : i32
    %c0_i32_0 = arith.constant 0 : i32
    %c0_i32_1 = arith.constant 0 : i32
    return %arg0, %c0_i32, %c0_i32_0 : i32, i32, i32
  }
  func.func @transform_1(%arg0: i32) -> (i32, i32) {
    %c0_i32 = arith.constant 0 : i32
    %c0_i32_0 = arith.constant 0 : i32
    %c0_i32_1 = arith.constant 0 : i32
    return %c0_i32, %c0_i32_0 : i32, i32
  }
  func.func @transform_2(%arg0: i32) -> (i32, i32, i32) {
    %c0_i32 = arith.constant 0 : i32
    %c0_i32_0 = arith.constant 0 : i32
    %c0_i32_1 = arith.constant 0 : i32
    %c0_i32_2 = arith.constant 0 : i32
    return %c0_i32, %c0_i32_0, %c0_i32_1 : i32, i32, i32
  }
  func.func @transform_3(%arg0: i32) -> (i32, i32) {
    %c0_i32 = arith.constant 0 : i32
    %c0_i32_0 = arith.constant 0 : i32
    %c0_i32_1 = arith.constant 0 : i32
    return %c0_i32, %c0_i32_0 : i32, i32
  }
  func.func @transform_4(%arg0: i32) -> (i32, i32, i32) {
    %c0_i32 = arith.constant 0 : i32
    %c0_i32_0 = arith.constant 0 : i32
    %c0_i32_1 = arith.constant 0 : i32
    %c0_i32_2 = arith.constant 0 : i32
    return %c0_i32, %c0_i32_0, %c0_i32_1 : i32, i32, i32
  }
  func.func @transform_5(%arg0: i32) -> (i32, i32) {
    %c0_i32 = arith.constant 0 : i32
    %c0_i32_0 = arith.constant 0 : i32
    %c0_i32_1 = arith.constant 0 : i32
    return %c0_i32, %c0_i32_0 : i32, i32
  }
  func.func @transform_6(%arg0: i32) -> (i32, i32) {
    %c0_i32 = arith.constant 0 : i32
    %c0_i32_0 = arith.constant 0 : i32
    %c0_i32_1 = arith.constant 0 : i32
    return %c0_i32, %c0_i32_0 : i32, i32
  }
  func.func @transform_7(%arg0: i32) -> (i32, i32) {
    %c0_i32 = arith.constant 0 : i32
    %c0_i32_0 = arith.constant 0 : i32
    %c0_i32_1 = arith.constant 0 : i32
    return %c0_i32, %c0_i32_0 : i32, i32
  }
  func.func @transform_8(%arg0: i32) -> (i32, i32, i32) {
    %c0_i32 = arith.constant 0 : i32
    %c0_i32_0 = arith.constant 0 : i32
    %c0_i32_1 = arith.constant 0 : i32
    return %arg0, %c0_i32, %c0_i32_0 : i32, i32, i32
  }
  func.func @transform_9(%arg0: i32) -> (i32, i32) {
    %c0_i32 = arith.constant 0 : i32
    %c0_i32_0 = arith.constant 0 : i32
    return %arg0, %c0_i32 : i32, i32
  }
}

</mosaic_0001>

<bundles_post_ra>
// kernel: tpu_custom_call.1
= control target key start
LH: loop header
LB: loop body
LE: loop exit
PB: predicated region body
PF: predicated region fallthrough
CT: control target
= control target key end

     0   :  { %15 = vsyncpa [#allocation5], 0  ;;  %s2003_s0 = inlined_call_operand.vmem [shape: f32[2,16,64], index: 0, kind: input, shape index: {}]   ;;  %s2004_s1 = inlined_call_operand.vmem [shape: f32[34,1], index: 1, kind: input, shape index: {}]   ;;  %s2005_s2 = inlined_call_operand.hbm [shape: f32[3,64,128], index: 2, kind: input, shape index: {}]   ;;  %s2006_s3 = inlined_call_operand.vmem [shape: f32[1,128], index: 3, kind: input, shape index: {}]   ;;  %s2007_s4 = inlined_call_operand.hbm [shape: f32[3,128,128], index: 4, kind: input, shape index: {}]   ;;  %s2008_s5 = inlined_call_operand.vmem [shape: f32[1,128], index: 5, kind: input, shape index: {}]   ;;  %s2009_s6 = inlined_call_operand.hbm [shape: f32[128,128], index: 6, kind: input, shape index: {}]   ;;  %s2010_s7 = inlined_call_operand.vmem [shape: f32[1,128], index: 7, kind: input, shape index: {}]   ;;  %s2011_s8 = inlined_call_operand.hbm [shape: f32[2,16,128], index: 8, kind: output, shape index: {0}]   ;;  %s2012_s9 = inlined_call_operand.hbm [shape: f32[2,128], index: 9, kind: output, shape index: {1}]  }
   0x1   :  { %16 = vsyncpa [#allocation8], 0 }
   0x2   :  { %17 = vsyncpa [#allocation6], 0 }
   0x3   :  { %18 = vsyncpa [#allocation12], 0  ;;  %s1696_s30 = smov [#allocation7]   ;;  %s1697_s11 = smov [#allocation4]  }
   0x4   :  { %s42_s10 = sshll.u32 %s1696_s30, 4  ;;  %s28_s12 = sshll.u32 %s1697_s11, 4  ;;  %s43_s10 = int_to_ptr.vmem [resolvable:$true] %s42_s10  ;;  %s1757_s12 = int_to_ptr.vmem [resolvable:$true] %s28_s12 }
   0x5   :  { %s1578_s15 = scalar_lea.hbm %s2007_s4, 6144 }
   0x6   :  { %p1579_p0 = scmp.ne.s32.totalorder %s2007_s4, %s1578_s15  ;;  %p1582_p1 = scmp.lt.u32.totalorder %s1578_s15, %s2007_s4 }
   0x8   :  { %p1584_p2 = pnand %p1582_p1, %p1579_p0 }
   0xa   :  { %1587 = shalt.err (!%p1584_p2)
}
   0xb   :  { %s1588_s20 = scalar_lea.vmem %s43_s10, 6144  ;;  %p1593_p4 = scmp.lt.s32.totalorder %s43_s10, %s43_s10 }
   0xc   :  { %p1589_p3 = scmp.ne.s32.totalorder %s43_s10, %s1588_s20  ;;  %p1594_p5 = scmp.lt.s32.totalorder %s1588_s20, %s1588_s20 }
   0xe   :  { %p1595_p6 = por %p1594_p5, %p1593_p4 }
  0x10   :  { %p1596_p7 = pnand %p1595_p6, %p1589_p3 }
  0x12   :  { %1599 = shalt.err (!%p1596_p7)
}
  0x13   :  { %s1698_s21 = smov 128   ;;  %s1699_s22 = smov 8  }
  0x14   :  { %48 = dma.hbm_to_vmem [thread:$0]  %s2007_s4, 6144, %s43_s10, [#allocation8], %s1698_s21, %s1698_s21, %s1699_s22  }
  0x15   :  { %s1600_s27 = scalar_lea.hbm %s2005_s2, 3072 }
  0x16   :  { %p1601_p8 = scmp.ne.s32.totalorder %s2005_s2, %s1600_s27  ;;  %p1604_p9 = scmp.lt.u32.totalorder %s1600_s27, %s2005_s2 }
  0x18   :  { %p1606_p10 = pnand %p1604_p9, %p1601_p8 }
  0x1a   :  { %1609 = shalt.err (!%p1606_p10)
}
  0x1b   :  { %s1610_s13 = scalar_lea.vmem %s1757_s12, 3072  ;;  %p1615_p12 = scmp.lt.s32.totalorder %s1757_s12, %s1757_s12 }
  0x1c   :  { %p1611_p11 = scmp.ne.s32.totalorder %s1757_s12, %s1610_s13  ;;  %p1616_p13 = scmp.lt.s32.totalorder %s1610_s13, %s1610_s13 }
  0x1e   :  { %p1617_p0 = por %p1616_p13, %p1615_p12 }
  0x20   :  { %p1618_p1 = pnand %p1617_p0, %p1611_p11 }
  0x22   :  { %1621 = shalt.err (!%p1618_p1)
}
  0x23   :  { %34 = dma.hbm_to_vmem [thread:$0]  %s2005_s2, 3072, %s1757_s12, [#allocation5], %s1698_s21, %s1698_s21, %s1699_s22  }
  0x24   :  { %s1700_s14 = smov [#allocation9]   ;;  %s1622_s18 = scalar_lea.hbm %s2009_s6, 2048 }
  0x25   :  { %s56_s15 = sshll.u32 %s1700_s14, 4  ;;  %p1623_p2 = scmp.ne.s32.totalorder %s2009_s6, %s1622_s18  ;;  %s57_s15 = int_to_ptr.vmem [resolvable:$true] %s56_s15 }
  0x26   :  { %p1626_p3 = scmp.lt.u32.totalorder %s1622_s18, %s2009_s6 }
  0x28   :  { %p1628_p4 = pnand %p1626_p3, %p1623_p2 }
  0x2a   :  { %1631 = shalt.err (!%p1628_p4)
}
  0x2b   :  { %s1632_s25 = scalar_lea.vmem %s57_s15, 2048  ;;  %p1637_p6 = scmp.lt.s32.totalorder %s57_s15, %s57_s15 }
  0x2c   :  { %p1633_p5 = scmp.ne.s32.totalorder %s57_s15, %s1632_s25  ;;  %p1638_p7 = scmp.lt.s32.totalorder %s1632_s25, %s1632_s25 }
  0x2e   :  { %p1639_p8 = por %p1638_p7, %p1637_p6 }
  0x30   :  { %p1640_p9 = pnand %p1639_p8, %p1633_p5 }
  0x32   :  { %1643 = shalt.err (!%p1640_p9)
}
  0x33   :  { %62 = dma.hbm_to_vmem [thread:$0]  %s2009_s6, 2048, %s57_s15, [#allocation8], %s1698_s21, %s1698_s21, %s1699_s22  }
  0x34   :  { %1688 = dma.done.wait [#allocation5], 3072  }
  0x35   :  { %1689 = vsyncadd [#allocation5], 4294964224 }
  0x36   :  { %1690 = dma.done.wait [#allocation8], 8192  }
  0x37   :  { %1691 = vsyncadd [#allocation8], 4294959104  ;;  %v1701_v0 = vmov 0.0|0.0   ;;  %v1702_v1 = vmov 0.0   ;;  %vm74_vm0 = vcmask 516096   ;;  %vm1703_vm1 = vmmov 0  }
  0x38   :  { %1433 = vmatprep.subr.bf16.mxu0 %v1701_v0  ;;  %1445 = vmatprep.subr.bf16.mxu1 %v1701_v0  ;;  %502 = vst [vmem:[#allocation3] sm:$0x1] %v1702_v1  ;;  %508 = vst [vmem:[#allocation3 + $0x23] sm:$0x1] %v1702_v1  ;;  %v1704_v2 = vmov 0   ;;  %v108_v3 = vld [vmem:[#allocation4 + $0x40] sm:$0xff] }
  0x39   :  { %1180 = vmatprep.mubr.msk.f32.mxu0 %vm1703_vm1, %v1702_v1  ;;  %1211 = vmatprep.mubr.msk.f32.mxu1 %vm1703_vm1, %v1702_v1  ;;  %75 = vst.msk [vmem:[#allocation2] sm:$0x1] %vm74_vm0, %v1702_v1  ;;  %81 = vst.msk [vmem:[#allocation2 + $0x11] sm:$0x1] %vm74_vm0, %v1702_v1  ;;  %v109_v4 = vld [vmem:[#allocation4 + $0x48] sm:$0xff]  ;;  %v94_v5 = vld [vmem:[#allocation4] sm:$0xff] }
  0x3a   :  { %82 = vst.msk [vmem:[#allocation2 + $0x12] sm:$0x1] %vm74_vm0, %v1702_v1  ;;  %88 = vst.msk [vmem:[#allocation2 + $0x23] sm:$0x1] %vm74_vm0, %v1702_v1  ;;  %1576 = vset.pattern.permute.xlu0 %v1704_v2  ;;  %1577 = vset.pattern.permute.xlu1 %v1704_v2  ;;  %v1434_v6 = vpack.c.bf16 %v109_v4, %v108_v3  ;;  %v95_v7 = vld [vmem:[#allocation4 + $0x8] sm:$0xff]  ;;  %v110_v8 = vld [vmem:[#allocation4 + $0x50] sm:$0xff] }
  0x3b   :  { %v111_v9 = vld [vmem:[#allocation4 + $0x58] sm:$0xff]  ;;  %v1446_v10 = vpack.c.bf16 %v95_v7, %v94_v5  ;;  %v96_v11 = vld [vmem:[#allocation4 + $0x10] sm:$0xff]  ;;  %vm78_vm2 = vcmask 523264   ;;  %v112_v15 = vld [vmem:[#allocation4 + $0x60] sm:$0xff]  ;;  %vm882_vm3 = vcmask 1045504   ;;  %vm897_vm4 = vcmask 1040384  }
  0x3c   :  { %v97_v12 = vld [vmem:[#allocation4 + $0x18] sm:$0xff]  ;;  %1435 = vmatpush3.bf16.msra.mxu0 %v1434_v6  ;;  %v1437_v13 = vpack.c.bf16 %v111_v9, %v110_v8  ;;  %v113_v16 = vld [vmem:[#allocation4 + $0x68] sm:$0xff]  ;;  %v98_v17 = vld [vmem:[#allocation4 + $0x20] sm:$0xff] }
  0x3d   :  { %1447 = vmatpush3.bf16.msra.mxu1 %v1446_v10  ;;  %1436 = vmatprep.subr.bf16.mxu0 %v1701_v0  ;;  %v1449_v14 = vpack.c.bf16 %v97_v12, %v96_v11  ;;  %v99_v18 = vld [vmem:[#allocation4 + $0x28] sm:$0xff]  ;;  %v76_v19 = vld [vmem:[%s2003_s0] sm:$0xff]  ;;  %v77_v20 = vld [vmem:[%s2003_s0 + $0x8] sm:$0xff]  ;;  %v1440_v21 = vpack.c.bf16 %v113_v16, %v112_v15 }
  0x3e   :  { %1448 = vmatprep.subr.bf16.mxu1 %v1701_v0  ;;  %79 = vst.msk [vmem:[#allocation2 + $0x1] sm:$0xff] %vm78_vm2, %v76_v19  ;;  %80 = vst.msk [vmem:[#allocation2 + $0x9] sm:$0xff] %vm78_vm2, %v77_v20  ;;  %v1025_v22 = vld [vmem:[%s2003_s0 + $0x10] sm:$0xff]  ;;  %v1452_v23 = vpack.c.bf16 %v99_v18, %v98_v17  ;;  %v114_v24 = vld [vmem:[#allocation4 + $0x70] sm:$0xff] }
  0x3f   :  { %v115_v25 = vld [vmem:[#allocation4 + $0x78] sm:$0xff]  ;;  %86 = vst.msk [vmem:[#allocation2 + $0x13] sm:$0xff] %vm78_vm2, %v1025_v22  ;;  %v1026_v26 = vld [vmem:[%s2003_s0 + $0x18] sm:$0xff]  ;;  %v100_v27 = vld [vmem:[#allocation4 + $0x30] sm:$0xff] }
  0x40   :  { %1438 = vmatpush3.bf16.msra.mxu0 %v1437_v13  ;;  %v101_v28 = vld [vmem:[#allocation4 + $0x38] sm:$0xff]  ;;  %87 = vst.msk [vmem:[#allocation2 + $0x1b] sm:$0xff] %vm78_vm2, %v1026_v26  ;;  %v467_v29 = vld [vmem:[%s2004_s1] sm:$0xff]  ;;  %v469_v30 = vld [vmem:[%s2004_s1 + $0x10] sm:$0xff]  ;;  %v1443_v31 = vpack.c.bf16 %v115_v25, %v114_v24 }
  0x41   :  { %1450 = vmatpush3.bf16.msra.mxu1 %v1449_v14  ;;  %1439 = vmatprep.subr.bf16.mxu0 %v1701_v0  ;;  %v468_v32 = vld [vmem:[%s2004_s1 + $0x8] sm:$0xff]  ;;  %v1455_v33 = vpack.c.bf16 %v101_v28, %v100_v27  ;;  %v332_v34 = vld [vmem:[#allocation4 + $0x80] sm:$0xff]  ;;  %v333_v35 = vld [vmem:[#allocation4 + $0x88] sm:$0xff] }
  0x42   :  { %1451 = vmatprep.subr.bf16.mxu1 %v1701_v0  ;;  %474 = vperm.xlu0 %1576, %v467_v29   ;;  %v470_v36 = vld [vmem:[%s2004_s1 + $0x18] sm:$0xff]  ;;  %v1458_v38 = vpack.c.bf16 %v333_v35, %v332_v34  ;;  %v471_v39 = vld [vmem:[%s2004_s1 + $0x20] sm:$0x3]  ;;  %v335_v42 = vld [vmem:[#allocation4 + $0x98] sm:$0xff] }
  0x43   :  { %484 = vperm.xlu1 %1577, %v469_v30   ;;  %v334_v41 = vld [vmem:[#allocation4 + $0x90] sm:$0xff]  ;;  %v336_v46 = vld [vmem:[#allocation4 + $0xa0] sm:$0xff]  ;;  %v337_v47 = vld [vmem:[#allocation4 + $0xa8] sm:$0xff] }
  0x44   :  { %1441 = vmatpush3.bf16.msra.mxu0 %v1440_v21  ;;  %v1461_v44 = vpack.c.bf16 %v335_v42, %v334_v41  ;;  %v1464_v50 = vpack.c.bf16 %v337_v47, %v336_v46  ;;  %v338_v51 = vld [vmem:[#allocation4 + $0xb0] sm:$0xff]  ;;  %v339_v52 = vld [vmem:[#allocation4 + $0xb8] sm:$0xff]  ;;  %v536_v63 = vld [vmem:[#allocation7 + $0x80] sm:$0xff] }
  0x45   :  { %1453 = vmatpush3.bf16.msra.mxu1 %v1452_v23  ;;  %1442 = vmatprep.subr.bf16.mxu0 %v1701_v0  ;;  %v102_v37 = vld [vmem:[#allocation2 + $0x1] sm:$0xff]  ;;  %v103_v43 = vld [vmem:[#allocation2 + $0x9] sm:$0xff]  ;;  %v1467_v55 = vpack.c.bf16 %v339_v52, %v338_v51  ;;  %v537_v2 = vld [vmem:[#allocation7 + $0x88] sm:$0xff] }
  0x46   :  { %1454 = vmatprep.subr.bf16.mxu1 %v1701_v0  ;;  %479 = vperm.xlu0 %1576, %v468_v32   ;;  %v89_v40 = vld [vmem:[#allocation2] sm:$0xff]  ;;  %v90_v45 = vld [vmem:[#allocation2 + $0x8] sm:$0xff]  ;;  %v104_v48 = vld [vmem:[#allocation2 + $0x11] sm:$0xff]  ;;  %v1470_v3 = vpack.c.bf16 %v537_v2, %v536_v63 }
  0x47   :  { %489 = vperm.xlu1 %1577, %v470_v36   ;;  %v91_v49 = vld [vmem:[#allocation2 + $0x10] sm:$0xff]  ;;  %v105_v53 = vld [vmem:[#allocation2 + $0x19] sm:$0xff]  ;;  %v106_v56 = vld [vmem:[#allocation2 + $0x21] sm:$0x3] }
  0x48   :  { %1444 = vmatpush3.bf16.msra.mxu0 %v1443_v31  ;;  %v92_v54 = vld [vmem:[#allocation2 + $0x18] sm:$0xff]  ;;  %v93_v57 = vld [vmem:[#allocation2 + $0x20] sm:$0x3]  ;;  %v326_v58 = vld [vmem:[#allocation2 + $0x2] sm:$0xff] }
  0x49   :  { %1456 = vmatpush3.bf16.msra.mxu1 %v1455_v33  ;;  %1457 = vmatprep.subr.bf16.mxu0 %v1701_v0  ;;  %v327_v59 = vld [vmem:[#allocation2 + $0xa] sm:$0xff]  ;;  %v328_v60 = vld [vmem:[#allocation2 + $0x12] sm:$0xff]  ;;  %v329_v61 = vld [vmem:[#allocation2 + $0x1a] sm:$0xff] }
  0x4a   :  { %1469 = vmatprep.subr.bf16.mxu1 %v1701_v0  ;;  %494 = vperm.xlu0 %1576, %v471_v39   ;;  %v330_v62 = vld [vmem:[#allocation2 + $0x22] sm:$0x3]  ;;  %v539_v5 = vld [vmem:[#allocation7 + $0x98] sm:$0xff]  ;;  %v540_v7 = vld [vmem:[#allocation7 + $0xa0] sm:$0xff] }
  0x4b   :  { %1181 = vmatmul.mubr.msk.f32.vlgmr.msra.gmra.mrb[0].mxu0 %vm78_vm2, %v102_v37  ;;  %v538_v4 = vld [vmem:[#allocation7 + $0x90] sm:$0xff]  ;;  %v541_v8 = vld [vmem:[#allocation7 + $0xa8] sm:$0xff]  ;;  %v514_v9 = vld [vmem:[#allocation7] sm:$0xff] }
  0x4c   :  { %1212 = vmatmul.mubr.msk.f32.vlgmr.msra.gmra.mrb[0].mxu1 %vm78_vm2, %v89_v40  ;;  %1459 = vmatpush3.bf16.msra.mxu0 %v1458_v38  ;;  %v1473_v6 = vpack.c.bf16 %v539_v5, %v538_v4  ;;  %v515_v10 = vld [vmem:[#allocation7 + $0x8] sm:$0xff]  ;;  %v1476_v11 = vpack.c.bf16 %v541_v8, %v540_v7  ;;  %v542_v13 = vld [vmem:[#allocation7 + $0xb0] sm:$0xff]  ;;  %v543_v14 = vld [vmem:[#allocation7 + $0xb8] sm:$0xff] }
  0x4d   :  { %1183 = vmatprep.mubr.msk.f32.mxu0 %vm1703_vm1, %v1702_v1  ;;  %1214 = vmatprep.mubr.msk.f32.mxu1 %vm1703_vm1, %v1702_v1  ;;  %v1494_v12 = vpack.c.bf16 %v515_v10, %v514_v9  ;;  %v516_v15 = vld [vmem:[#allocation7 + $0x10] sm:$0xff]  ;;  %v517_v16 = vld [vmem:[#allocation7 + $0x18] sm:$0xff]  ;;  %v1479_v17 = vpack.c.bf16 %v543_v14, %v542_v13  ;;  %v544_v19 = vld [vmem:[#allocation7 + $0xc0] sm:$0xff] }
  0x4e   :  { %1460 = vmatprep.subr.bf16.mxu0 %v1701_v0  ;;  %1471 = vmatpush3.bf16.msra.mxu1 %v1470_v3  ;;  %v1497_v18 = vpack.c.bf16 %v517_v16, %v516_v15  ;;  %v545_v20 = vld [vmem:[#allocation7 + $0xc8] sm:$0xff]  ;;  %v518_v21 = vld [vmem:[#allocation7 + $0x20] sm:$0xff]  ;;  %v546_v25 = vld [vmem:[#allocation7 + $0xd0] sm:$0xff] }
  0x4f   :  { %1184 = vmatmul.mubr.msk.f32.gmra.mrb[2].mxu0 %vm78_vm2, %v103_v43  ;;  %1472 = vmatprep.subr.bf16.mxu1 %v1701_v0  ;;  %v519_v22 = vld [vmem:[#allocation7 + $0x28] sm:$0xff]  ;;  %v1482_v23 = vpack.c.bf16 %v545_v20, %v544_v19  ;;  %v547_v26 = vld [vmem:[#allocation7 + $0xd8] sm:$0xff]  ;;  %v520_v27 = vld [vmem:[#allocation7 + $0x30] sm:$0xff] }
  0x50   :  { %1215 = vmatmul.mubr.msk.f32.gmra.mrb[2].mxu1 %vm78_vm2, %v90_v45  ;;  %1462 = vmatpush3.bf16.msra.mxu0 %v1461_v44  ;;  %v1500_v24 = vpack.c.bf16 %v519_v22, %v518_v21  ;;  %v521_v28 = vld [vmem:[#allocation7 + $0x38] sm:$0xff]  ;;  %v1485_v29 = vpack.c.bf16 %v547_v26, %v546_v25  ;;  %v548_v31 = vld [vmem:[#allocation7 + $0xe0] sm:$0xff]  ;;  %v549_v32 = vld [vmem:[#allocation7 + $0xe8] sm:$0xff] }
  0x51   :  { %1186 = vmatprep.mubr.msk.f32.mxu0 %vm1703_vm1, %v1702_v1  ;;  %1217 = vmatprep.mubr.msk.f32.mxu1 %vm1703_vm1, %v1702_v1  ;;  %v1503_v30 = vpack.c.bf16 %v521_v28, %v520_v27  ;;  %v522_v33 = vld [vmem:[#allocation7 + $0x40] sm:$0xff]  ;;  %v523_v34 = vld [vmem:[#allocation7 + $0x48] sm:$0xff]  ;;  %v1488_v35 = vpack.c.bf16 %v549_v32, %v548_v31  ;;  %v550_v37 = vld [vmem:[#allocation7 + $0xf0] sm:$0xff] }
  0x52   :  { %1463 = vmatprep.subr.bf16.mxu0 %v1701_v0  ;;  %1474 = vmatpush3.bf16.msra.mxu1 %v1473_v6  ;;  %v1506_v36 = vpack.c.bf16 %v523_v34, %v522_v33  ;;  %v551_v38 = vld [vmem:[#allocation7 + $0xf8] sm:$0xff]  ;;  %v524_v39 = vld [vmem:[#allocation7 + $0x50] sm:$0xff]  ;;  %v526_v43 = vld [vmem:[#allocation7 + $0x60] sm:$0xff] }
  0x53   :  { %1187 = vmatmul.mubr.msk.f32.gmra.mrb[4].mxu0 %vm78_vm2, %v104_v48  ;;  %1475 = vmatprep.subr.bf16.mxu1 %v1701_v0  ;;  %v525_v40 = vld [vmem:[#allocation7 + $0x58] sm:$0xff]  ;;  %v1491_v41 = vpack.c.bf16 %v551_v38, %v550_v37  ;;  %v527_v44 = vld [vmem:[#allocation7 + $0x68] sm:$0xff]  ;;  %v528_v46 = vld [vmem:[#allocation7 + $0x70] sm:$0xff] }
  0x54   :  { %1218 = vmatmul.mubr.msk.f32.gmra.mrb[4].mxu1 %vm78_vm2, %v91_v49  ;;  %1189 = vmatprep.mubr.msk.f32.mxu0 %vm1703_vm1, %v1702_v1  ;;  %v1509_v42 = vpack.c.bf16 %v525_v40, %v524_v39  ;;  %v1512_v45 = vpack.c.bf16 %v527_v44, %v526_v43  ;;  %v529_v47 = vld [vmem:[#allocation7 + $0x78] sm:$0xff]  ;;  %v1042_v13 = vld [vmem:[%s2006_s3] ss:$0 sm:$0xff]  ;;  %v742_v38 = vld [vmem:[#allocation7 + $0x120] sm:$0xff] }
  0x55   :  { %1465 = vmatpush3.bf16.msra.mxu0 %v1464_v50  ;;  %1220 = vmatprep.mubr.msk.f32.mxu1 %vm1703_vm1, %v1702_v1  ;;  %v1515_v48 = vpack.c.bf16 %v529_v47, %v528_v46  ;;  %v740_v27 = vld [vmem:[#allocation7 + $0x110] sm:$0xff]  ;;  %v741_v28 = vld [vmem:[#allocation7 + $0x118] sm:$0xff]  ;;  %v743_v39 = vld [vmem:[#allocation7 + $0x128] sm:$0xff] }
  0x56   :  { %1466 = vmatprep.subr.bf16.mxu0 %v1701_v0  ;;  %1477 = vmatpush3.bf16.msra.mxu1 %v1476_v11  ;;  %v1524_v44 = vpack.c.bf16 %v743_v39, %v742_v38  ;;  %v744_v47 = vld [vmem:[#allocation7 + $0x130] sm:$0xff]  ;;  %v911_v38 = vld [vmem:[#allocation9 + $0x60] sm:$0xff]  ;;  %v912_v39 = vld [vmem:[#allocation9 + $0x68] sm:$0xff] }
  0x57   :  { %1190 = vmatmul.mubr.msk.f32.gmra.mrb[6].mxu0 %vm78_vm2, %v105_v53  ;;  %1478 = vmatprep.subr.bf16.mxu1 %v1701_v0 }
  0x58   :  { %1221 = vmatmul.mubr.msk.f32.gmra.mrb[6].mxu1 %vm78_vm2, %v92_v54  ;;  %1192 = vmatprep.mubr.msk.f32.mxu0 %vm1703_vm1, %v1702_v1 }
  0x59   :  { %1223 = vmatprep.mubr.msk.f32.mxu1 %vm1703_vm1, %v1702_v1  ;;  %1468 = vmatpush3.bf16.msra.mxu0 %v1467_v55 }
  0x5a   :  { %1493 = vmatprep.subr.bf16.mxu0 %v1701_v0  ;;  %1480 = vmatpush3.bf16.msra.mxu1 %v1479_v17  ;;  %v738_v17 = vld [vmem:[#allocation7 + $0x100] sm:$0xff] }
  0x5b   :  { %1193 = vmatmul.mubr.msk.f32.gmra.mrb[8].mxu0 %vm78_vm2, %v106_v56  ;;  %1481 = vmatprep.subr.bf16.mxu1 %v1701_v0 }
  0x5c   :  { %1224 = vmatmul.mubr.msk.f32.gmra.mrb[8].mxu1 %vm78_vm2, %v93_v57  ;;  %1242 = vmatprep.mubr.msk.f32.mxu0 %vm1703_vm1, %v1702_v1 }
  0x5d   :  { %1289 = vmatprep.mubr.msk.f32.mxu1 %vm1703_vm1, %v1702_v1 }
  0x5e   :  { %1483 = vmatpush3.bf16.msra.mxu1 %v1482_v23 }
  0x5f   :  { %1243 = vmatmul.mubr.msk.f32.vlgmr.msra.gmra.mrb[10].mxu0 %vm78_vm2, %v326_v58  ;;  %1484 = vmatprep.subr.bf16.mxu1 %v1701_v0 }
  0x60   :  { %1245 = vmatprep.mubr.msk.f32.mxu0 %vm1703_vm1, %v1702_v1  ;;  %1495 = vmatpush3.bf16.msra.mxu0 %v1494_v12 }
  0x61   :  { %1496 = vmatprep.subr.bf16.mxu0 %v1701_v0 }
  0x62   :  { %1486 = vmatpush3.bf16.msra.mxu1 %v1485_v29 }
  0x63   :  { %1246 = vmatmul.mubr.msk.f32.gmra.mrb[12].mxu0 %vm78_vm2, %v327_v59  ;;  %1487 = vmatprep.subr.bf16.mxu1 %v1701_v0 }
  0x64   :  { %1248 = vmatprep.mubr.msk.f32.mxu0 %vm1703_vm1, %v1702_v1  ;;  %1498 = vmatpush3.bf16.msra.mxu0 %v1497_v18  ;;  %v739_v18 = vld [vmem:[#allocation7 + $0x108] sm:$0xff] }
  0x65   :  { %1499 = vmatprep.subr.bf16.mxu0 %v1701_v0 }
  0x66   :  { %1489 = vmatpush3.bf16.msra.mxu1 %v1488_v35  ;;  %v1521_v35 = vpack.c.bf16 %v741_v28, %v740_v27  ;;  %v903_v27 = vld [vmem:[#allocation9 + $0x20] sm:$0xff]  ;;  %v904_v28 = vld [vmem:[#allocation9 + $0x28] sm:$0xff] }
  0x67   :  { %1249 = vmatmul.mubr.msk.f32.gmra.mrb[14].mxu0 %vm78_vm2, %v328_v60  ;;  %1490 = vmatprep.subr.bf16.mxu1 %v1701_v0 }
  0x68   :  { %1251 = vmatprep.mubr.msk.f32.mxu0 %vm1703_vm1, %v1702_v1  ;;  %1501 = vmatpush3.bf16.msra.mxu0 %v1500_v24  ;;  %v1518_v24 = vpack.c.bf16 %v739_v18, %v738_v17 }
  0x69   :  { %1502 = vmatprep.subr.bf16.mxu0 %v1701_v0 }
  0x6a   :  { %1492 = vmatpush3.bf16.msra.mxu1 %v1491_v41 }
  0x6b   :  { %1252 = vmatmul.mubr.msk.f32.gmra.mrb[16].mxu0 %vm78_vm2, %v329_v61  ;;  %1517 = vmatprep.subr.bf16.mxu1 %v1701_v0 }
  0x6c   :  { %1254 = vmatprep.mubr.msk.f32.mxu0 %vm1703_vm1, %v1702_v1  ;;  %1504 = vmatpush3.bf16.msra.mxu0 %v1503_v30 }
  0x6d   :  { %1505 = vmatprep.subr.bf16.mxu0 %v1701_v0 }
  0x6f   :  { %1255 = vmatmul.mubr.msk.f32.gmra.mrb[18].mxu0 %vm78_vm2, %v330_v62 }
  0x70   :  { %1336 = vmatprep.mubr.msk.f32.mxu0 %vm1703_vm1, %v1702_v1  ;;  %1507 = vmatpush3.bf16.msra.mxu0 %v1506_v36 }
  0x71   :  { %1508 = vmatprep.subr.bf16.mxu0 %v1701_v0 }
  0x74   :  { %1510 = vmatpush3.bf16.msra.mxu0 %v1509_v42 }
  0x75   :  { %1511 = vmatprep.subr.bf16.mxu0 %v1701_v0 }
  0x78   :  { %1513 = vmatpush3.bf16.msra.mxu0 %v1512_v45 }
  0x79   :  { %1514 = vmatprep.subr.bf16.mxu0 %v1701_v0 }
  0x7c   :  { %1516 = vmatpush3.bf16.msra.mxu0 %v1515_v48  ;;  %v745_v48 = vld [vmem:[#allocation7 + $0x138] sm:$0xff] }
  0x7d   :  { %1541 = vmatprep.subr.bf16.mxu0 %v1701_v0 }
  0xc1   :  { %v475_v19 = vpop.permute.xlu0 %474 }
  0xc2   :  { %v485_v34 = vpop.permute.xlu1 %484 }
  0xc5   :  { %v480_v33 = vpop.permute.xlu0 %479 }
 0x11e   :  { %v197_v49 = vpop.f32.mrb[0].mxu0 }
 0x11f   :  { %v1182_v50 = vpop.f32.mrb[1].mxu0  ;;  %v302_v51 = vpop.f32.mrb[0].mxu1 }
 0x120   :  { %v303_v52 = vadd.f32 %v302_v51, %v197_v49  ;;  %v1213_v53 = vpop.f32.mrb[1].mxu1  ;;  %v490_v51 = vpop.permute.xlu1 %489 }
 0x122   :  { %v202_v54 = vpop.f32.mrb[2].mxu0 }
 0x123   :  { %v1185_v55 = vpop.f32.mrb[3].mxu0  ;;  %v307_v56 = vpop.f32.mrb[2].mxu1 }
 0x124   :  { %v308_v57 = vadd.f32 %v307_v56, %v202_v54  ;;  %v1216_v58 = vpop.f32.mrb[3].mxu1  ;;  %v1527_v55 = vpack.c.bf16 %v745_v48, %v744_v47 }
 0x125   :  { %v746_v58 = vld [vmem:[#allocation7 + $0x140] sm:$0xff] }
 0x126   :  { %v207_v59 = vpop.f32.mrb[4].mxu0 }
 0x127   :  { %v1188_v60 = vpop.f32.mrb[5].mxu0  ;;  %v312_v61 = vpop.f32.mrb[4].mxu1 }
 0x128   :  { %v313_v62 = vadd.f32 %v312_v61, %v207_v59  ;;  %v1219_v63 = vpop.f32.mrb[5].mxu1  ;;  %v747_v59 = vld [vmem:[#allocation7 + $0x148] sm:$0xff] }
 0x129   :  { %v1530_v63 = vpack.c.bf16 %v747_v59, %v746_v58 }
 0x12a   :  { %v212_v2 = vpop.f32.mrb[6].mxu0 }
 0x12b   :  { %v1191_v3 = vpop.f32.mrb[7].mxu0  ;;  %v317_v4 = vpop.f32.mrb[6].mxu1 }
 0x12c   :  { %v318_v5 = vadd.f32 %v317_v4, %v212_v2  ;;  %v1222_v6 = vpop.f32.mrb[7].mxu1  ;;  %v748_v3 = vld [vmem:[#allocation7 + $0x150] sm:$0xff]  ;;  %v749_v4 = vld [vmem:[#allocation7 + $0x158] sm:$0xff] }
 0x12d   :  { %v1533_v6 = vpack.c.bf16 %v749_v4, %v748_v3 }
 0x12e   :  { %v217_v7 = vpop.f32.mrb[8].mxu0 }
 0x12f   :  { %v1194_v8 = vpop.f32.mrb[9].mxu0  ;;  %v322_v9 = vpop.f32.mrb[8].mxu1 }
 0x130   :  { %v323_v10 = vadd.f32 %v322_v9, %v217_v7  ;;  %v1225_v11 = vpop.f32.mrb[9].mxu1  ;;  %v750_v7 = vld [vmem:[#allocation7 + $0x160] sm:$0xff]  ;;  %v751_v8 = vld [vmem:[#allocation7 + $0x168] sm:$0xff] }
 0x131   :  { %v752_v11 = vld [vmem:[#allocation7 + $0x170] sm:$0xff] }
 0x132   :  { %v421_v12 = vpop.f32.mrb[10].mxu0 }
 0x133   :  { %v445_v14 = vadd.f32 %v421_v12, %v303_v52  ;;  %v1244_v15 = vpop.f32.mrb[11].mxu0  ;;  %v753_v12 = vld [vmem:[#allocation7 + $0x178] sm:$0xff] }
 0x134   :  { %v1539_v15 = vpack.c.bf16 %v753_v12, %v752_v11 }
 0x135   :  { %v457_v16 = vadd.f32 %v1042_v13, %v445_v14 }
 0x136   :  { %v426_v20 = vpop.f32.mrb[12].mxu0 }
 0x137   :  { %v462_v21 = vmax.f32 %v457_v16, 0.0  ;;  %v446_v22 = vadd.f32 %v426_v20, %v308_v57  ;;  %v1247_v23 = vpop.f32.mrb[13].mxu0 }
 0x139   :  { %v497_v25 = vmul.f32 %v475_v19, %v462_v21  ;;  %v458_v26 = vadd.f32 %v1042_v13, %v446_v22  ;;  %v899_v21 = vld [vmem:[#allocation9] sm:$0xff]  ;;  %v900_v22 = vld [vmem:[#allocation9 + $0x8] sm:$0xff] }
 0x13a   :  { %v431_v29 = vpop.f32.mrb[14].mxu0  ;;  %v1542_v23 = vpack.c.bf16 %v900_v22, %v899_v21 }
 0x13b   :  { %503 = vst [vmem:[#allocation3 + $0x1] sm:$0xff] %v497_v25  ;;  %v463_v30 = vmax.f32 %v458_v26, 0.0  ;;  %v447_v31 = vadd.f32 %v431_v29, %v313_v62  ;;  %v1250_v32 = vpop.f32.mrb[15].mxu0  ;;  %1290 = vmatmul.mubr.f32.vlgmr.msra.gmra.mrb[10].mxu1 %v497_v25  ;;  %v495_v62 = vpop.permute.xlu0 %494  ;;  %v902_v25 = vld [vmem:[#allocation9 + $0x18] sm:$0xff]  ;;  %v1548_v29 = vpack.c.bf16 %v904_v28, %v903_v27 }
 0x13c   :  { %1519 = vmatpush3.bf16.msra.mxu1 %v1518_v24  ;;  %1292 = vmatprep.mubr.msk.f32.mxu1 %vm1703_vm1, %v1702_v1  ;;  %v901_v24 = vld [vmem:[#allocation9 + $0x10] sm:$0xff]  ;;  %v907_v32 = vld [vmem:[#allocation9 + $0x40] sm:$0xff] }
 0x13d   :  { %v498_v36 = vmul.f32 %v480_v33, %v463_v30  ;;  %v459_v37 = vadd.f32 %v1042_v13, %v447_v31  ;;  %1520 = vmatprep.subr.bf16.mxu1 %v1701_v0  ;;  %v1545_v26 = vpack.c.bf16 %v902_v25, %v901_v24  ;;  %v906_v30 = vld [vmem:[#allocation9 + $0x38] sm:$0xff]  ;;  %v908_v33 = vld [vmem:[#allocation9 + $0x48] sm:$0xff] }
 0x13e   :  { %v436_v40 = vpop.f32.mrb[16].mxu0 }
 0x13f   :  { %504 = vst [vmem:[#allocation3 + $0x9] sm:$0xff] %v498_v36  ;;  %v448_v41 = vadd.f32 %v436_v40, %v318_v5  ;;  %v464_v42 = vmax.f32 %v459_v37, 0.0  ;;  %v1253_v43 = vpop.f32.mrb[17].mxu0  ;;  %1293 = vmatmul.mubr.f32.gmra.mrb[12].mxu1 %v498_v36  ;;  %v910_v36 = vld [vmem:[#allocation9 + $0x58] sm:$0xff]  ;;  %v1560_v40 = vpack.c.bf16 %v912_v39, %v911_v38 }
 0x140   :  { %1522 = vmatpush3.bf16.msra.mxu1 %v1521_v35  ;;  %1295 = vmatprep.mubr.msk.f32.mxu1 %vm1703_vm1, %v1702_v1  ;;  %v909_v35 = vld [vmem:[#allocation9 + $0x50] sm:$0xff] }
 0x141   :  { %v460_v45 = vadd.f32 %v1042_v13, %v448_v41  ;;  %v499_v46 = vmul.f32 %v485_v34, %v464_v42  ;;  %1523 = vmatprep.subr.bf16.mxu1 %v1701_v0  ;;  %v1554_v34 = vpack.c.bf16 %v908_v33, %v907_v32  ;;  %v1557_v37 = vpack.c.bf16 %v910_v36, %v909_v35  ;;  %v913_v41 = vld [vmem:[#allocation9 + $0x70] sm:$0xff]  ;;  %v914_v42 = vld [vmem:[#allocation9 + $0x78] sm:$0xff] }
 0x142   :  { %v441_v49 = vpop.f32.mrb[18].mxu0  ;;  %v509_v50 = vld [vmem:[#allocation3] sm:$0xff]  ;;  %v1563_v43 = vpack.c.bf16 %v914_v42, %v913_v41 }
 0x143   :  { %505 = vst [vmem:[#allocation3 + $0x11] sm:$0xff] %v499_v46  ;;  %v449_v52 = vadd.f32 %v441_v49, %v323_v10  ;;  %1337 = vmatmul.mubr.f32.vlgmr.msra.gmra.mrb[20].mxu0 %v509_v50  ;;  %v465_v53 = vmax.f32 %v460_v45, 0.0  ;;  %1296 = vmatmul.mubr.f32.gmra.mrb[14].mxu1 %v499_v46  ;;  %v1256_v54 = vpop.f32.mrb[19].mxu0  ;;  %v1536_v10 = vpack.c.bf16 %v751_v8, %v750_v7  ;;  %v1043_v7 = vld [vmem:[%s2008_s5] ss:$0 sm:$0xff]  ;;  %s1705_s5 = smov [#allocation10]  }
 0x144   :  { %1339 = vmatprep.mubr.msk.f32.mxu0 %vm1703_vm1, %v1702_v1  ;;  %1525 = vmatpush3.bf16.msra.mxu1 %v1524_v44  ;;  %s998_s25 = sshll.u32 %s1705_s5, 4  ;;  %s999_s25 = int_to_ptr.vmem [resolvable:$true] %s998_s25 }
 0x145   :  { %v461_v56 = vadd.f32 %v1042_v13, %v449_v52  ;;  %v500_v57 = vmul.f32 %v490_v51, %v465_v53  ;;  %1298 = vmatprep.mubr.msk.f32.mxu1 %vm1703_vm1, %v1702_v1  ;;  %1526 = vmatprep.subr.bf16.mxu1 %v1701_v0  ;;  %s1644_s2 = scalar_lea.vmem %s999_s25, 512  ;;  %p1649_p11 = scmp.lt.s32.totalorder %s999_s25, %s999_s25 }
 0x146   :  { %v510_v60 = vld [vmem:[#allocation3 + $0x8] sm:$0xff]  ;;  %1543 = vmatpush3.bf16.msra.mxu0 %v1542_v23  ;;  %p1645_p10 = scmp.ne.s32.totalorder %s999_s25, %s1644_s2  ;;  %p1650_p12 = scmp.lt.s32.totalorder %s1644_s2, %s1644_s2 }
 0x147   :  { %v466_v61 = vmax.f32 %v461_v56, 0.0  ;;  %506 = vst [vmem:[#allocation3 + $0x19] sm:$0xff] %v500_v57  ;;  %1340 = vmatmul.mubr.f32.gmra.mrb[22].mxu0 %v510_v60  ;;  %1299 = vmatmul.mubr.f32.gmra.mrb[16].mxu1 %v500_v57  ;;  %v732_v16 = vld [vmem:[#allocation3 + $0x2] sm:$0xff] }
 0x148   :  { %1342 = vmatprep.mubr.msk.f32.mxu0 %vm1703_vm1, %v1702_v1  ;;  %1528 = vmatpush3.bf16.msra.mxu1 %v1527_v55  ;;  %p1651_p13 = por %p1650_p12, %p1649_p11 }
 0x149   :  { %v501_v2 = vmul.f32 %v495_v62, %v466_v61  ;;  %1301 = vmatprep.mubr.msk.f32.mxu1 %vm1703_vm1, %v1702_v1  ;;  %1529 = vmatprep.subr.bf16.mxu1 %v1701_v0 }
 0x14a   :  { %v511_v5 = vld [vmem:[#allocation3 + $0x10] sm:$0xff]  ;;  %1544 = vmatprep.subr.bf16.mxu0 %v1701_v0  ;;  %p1652_p0 = pnand %p1651_p13, %p1645_p10 }
 0x14b   :  { %507 = vst [vmem:[#allocation3 + $0x21] sm:$0x3] %v501_v2  ;;  %1343 = vmatmul.mubr.f32.gmra.mrb[24].mxu0 %v511_v5  ;;  %v733_v17 = vld [vmem:[#allocation3 + $0xa] sm:$0xff] }
 0x14c   :  { %1345 = vmatprep.mubr.msk.f32.mxu0 %vm1703_vm1, %v1702_v1  ;;  %1531 = vmatpush3.bf16.msra.mxu1 %v1530_v63 }
 0x14d   :  { %1532 = vmatprep.subr.bf16.mxu1 %v1701_v0  ;;  %1546 = vmatpush3.bf16.msra.mxu0 %v1545_v26 }
 0x14e   :  { %v512_v9 = vld [vmem:[#allocation3 + $0x18] sm:$0xff]  ;;  %1547 = vmatprep.subr.bf16.mxu0 %v1701_v0 }
 0x14f   :  { %1346 = vmatmul.mubr.f32.gmra.mrb[26].mxu0 %v512_v9  ;;  %v734_v18 = vld [vmem:[#allocation3 + $0x12] sm:$0xff] }
 0x150   :  { %1348 = vmatprep.mubr.msk.f32.mxu0 %vm1703_vm1, %v1702_v1  ;;  %1534 = vmatpush3.bf16.msra.mxu1 %v1533_v6 }
 0x151   :  { %1535 = vmatprep.subr.bf16.mxu1 %v1701_v0  ;;  %1549 = vmatpush3.bf16.msra.mxu0 %v1548_v29 }
 0x152   :  { %v534_v13 = vld [vmem:[#allocation3 + $0x21] sm:$0x3]  ;;  %1550 = vmatprep.subr.bf16.mxu0 %v1701_v0 }
 0x153   :  { %v513_v14 = vld [vmem:[#allocation3 + $0x20] sm:$0x3]  ;;  %1302 = vmatmul.mubr.f32.gmra.mrb[18].mxu1 %v534_v13  ;;  %v736_v20 = vld [vmem:[#allocation3 + $0x22] sm:$0x3] }
 0x154   :  { %1349 = vmatmul.mubr.f32.gmra.mrb[28].mxu0 %v513_v14  ;;  %1537 = vmatpush3.bf16.msra.mxu1 %v1536_v10  ;;  %v735_v19 = vld [vmem:[#allocation3 + $0x1a] sm:$0xff] }
 0x155   :  { %1383 = vmatprep.mubr.msk.f32.mxu1 %vm1703_vm1, %v1702_v1  ;;  %1538 = vmatprep.subr.bf16.mxu1 %v1701_v0 }
 0x156   :  { %1430 = vmatprep.mubr.msk.f32.mxu0 %vm1703_vm1, %v1702_v1 }
 0x158   :  { %1540 = vmatpush3.bf16.msra.mxu1 %v1539_v15 }
 0x15b   :  { %1384 = vmatmul.mubr.f32.vlgmr.msra.gmra.mrb[20].mxu1 %v732_v16 }
 0x15c   :  { %1386 = vmatprep.mubr.msk.f32.mxu1 %vm1703_vm1, %v1702_v1 }
 0x15f   :  { %1387 = vmatmul.mubr.f32.gmra.mrb[22].mxu1 %v733_v17 }
 0x160   :  { %1389 = vmatprep.mubr.msk.f32.mxu1 %vm1703_vm1, %v1702_v1 }
 0x163   :  { %1390 = vmatmul.mubr.f32.gmra.mrb[24].mxu1 %v734_v18 }
 0x164   :  { %1392 = vmatprep.mubr.msk.f32.mxu1 %vm1703_vm1, %v1702_v1 }
 0x167   :  { %1393 = vmatmul.mubr.f32.gmra.mrb[26].mxu1 %v735_v19 }
 0x168   :  { %1395 = vmatprep.mubr.msk.f32.mxu1 %vm1703_vm1, %v1702_v1  ;;  %v905_v1 = vld [vmem:[#allocation9 + $0x30] sm:$0xff] }
 0x169   :  { %v1551_v31 = vpack.c.bf16 %v906_v30, %v905_v1 }
 0x16b   :  { %1396 = vmatmul.mubr.f32.gmra.mrb[28].mxu1 %v736_v20  ;;  %1552 = vmatpush3.bf16.msra.mxu0 %v1551_v31 }
 0x16c   :  { %1553 = vmatprep.subr.bf16.mxu0 %v1701_v0 }
 0x16f   :  { %1555 = vmatpush3.bf16.msra.mxu0 %v1554_v34 }
 0x170   :  { %1556 = vmatprep.subr.bf16.mxu0 %v1701_v0 }
 0x173   :  { %1558 = vmatpush3.bf16.msra.mxu0 %v1557_v37 }
 0x174   :  { %1559 = vmatprep.subr.bf16.mxu0 %v1701_v0 }
 0x177   :  { %1561 = vmatpush3.bf16.msra.mxu0 %v1560_v40 }
 0x178   :  { %1562 = vmatprep.subr.bf16.mxu0 %v1701_v0 }
 0x17b   :  { %1564 = vmatpush3.bf16.msra.mxu0 %v1563_v43 }
 0x20e   :  { %v618_v44 = vpop.f32.mrb[10].mxu1 }
 0x20f   :  { %v1291_v45 = vpop.f32.mrb[11].mxu1 }
 0x212   :  { %v623_v46 = vpop.f32.mrb[12].mxu1 }
 0x213   :  { %v1294_v47 = vpop.f32.mrb[13].mxu1 }
 0x216   :  { %v708_v48 = vpop.f32.mrb[20].mxu0  ;;  %v628_v49 = vpop.f32.mrb[14].mxu1 }
 0x217   :  { %v709_v50 = vadd.f32 %v708_v48, %v618_v44  ;;  %v1338_v51 = vpop.f32.mrb[21].mxu0  ;;  %v1297_v52 = vpop.f32.mrb[15].mxu1 }
 0x21a   :  { %v713_v53 = vpop.f32.mrb[22].mxu0  ;;  %v633_v54 = vpop.f32.mrb[16].mxu1 }
 0x21b   :  { %v714_v55 = vadd.f32 %v713_v53, %v623_v46  ;;  %v1341_v56 = vpop.f32.mrb[23].mxu0  ;;  %v1300_v57 = vpop.f32.mrb[17].mxu1 }
 0x21e   :  { %v718_v58 = vpop.f32.mrb[24].mxu0 }
 0x21f   :  { %v719_v59 = vadd.f32 %v718_v58, %v628_v49  ;;  %v1344_v60 = vpop.f32.mrb[25].mxu0 }
 0x222   :  { %v723_v61 = vpop.f32.mrb[26].mxu0 }
 0x223   :  { %v724_v0 = vadd.f32 %v723_v61, %v633_v54  ;;  %v1347_v62 = vpop.f32.mrb[27].mxu0 }
 0x226   :  { %v638_v63 = vpop.f32.mrb[18].mxu1 }
 0x227   :  { %v728_v2 = vpop.f32.mrb[28].mxu0  ;;  %v1303_v4 = vpop.f32.mrb[19].mxu1 }
 0x228   :  { %v729_v3 = vadd.f32 %v728_v2, %v638_v63  ;;  %v1350_v5 = vpop.f32.mrb[29].mxu0 }
 0x22e   :  { %v820_v6 = vpop.f32.mrb[20].mxu1 }
 0x22f   :  { %v844_v8 = vadd.f32 %v820_v6, %v709_v50  ;;  %v1385_v9 = vpop.f32.mrb[21].mxu1 }
 0x231   :  { %v856_v10 = vadd.f32 %v1043_v7, %v844_v8 }
 0x232   :  { %v825_v11 = vpop.f32.mrb[22].mxu1 }
 0x233   :  { %861 = vst [vmem:[#allocation10] sm:$0xff] %v856_v10  ;;  %v845_v12 = vadd.f32 %v825_v11, %v714_v55  ;;  %v1388_v13 = vpop.f32.mrb[23].mxu1  ;;  %v863_v16 = vmax.f32 %v856_v10, 0.0 }
 0x235   :  { %v857_v14 = vadd.f32 %v1043_v7, %v845_v12 }
 0x236   :  { %v830_v15 = vpop.f32.mrb[24].mxu1 }
 0x237   :  { %862 = vst [vmem:[#allocation10 + $0x8] sm:$0xff] %v857_v14  ;;  %v864_v17 = vmax.f32 %v857_v14, 0.0  ;;  %v846_v18 = vadd.f32 %v830_v15, %v719_v59  ;;  %v1391_v19 = vpop.f32.mrb[25].mxu1 }
 0x239   :  { %v865_v20 = vadd.f32 %v864_v17, %v863_v16  ;;  %v858_v21 = vadd.f32 %v1043_v7, %v846_v18 }
 0x23a   :  { %v835_v22 = vpop.f32.mrb[26].mxu1 }
 0x23b   :  { %873 = vst [vmem:[#allocation10 + $0xe] sm:$0xfc] %v858_v21  ;;  %v847_v23 = vadd.f32 %v835_v22, %v724_v0  ;;  %v1394_v24 = vpop.f32.mrb[27].mxu1  ;;  %v876_v25 = vmax.f32 %v858_v21, 0.0  ;;  %v866_v30 = vrot.slane %v865_v20, 4 }
 0x23d   :  { %v859_v26 = vadd.f32 %v1043_v7, %v847_v23  ;;  %v883_v31 = vrot.slane %v876_v25, 2  ;;  %v867_v36 = vadd.f32 %v866_v30, %v865_v20 }
 0x23e   :  { %v840_v27 = vpop.f32.mrb[28].mxu1 }
 0x23f   :  { %874 = vst [vmem:[#allocation10 + $0x16] sm:$0xff] %v859_v26  ;;  %v877_v28 = vmax.f32 %v859_v26, 0.0  ;;  %v848_v29 = vadd.f32 %v840_v27, %v729_v3  ;;  %v1397_v1 = vpop.f32.mrb[29].mxu1  ;;  %v868_v39 = vrot.slane %v867_v36, 2 }
 0x241   :  { %v884_v32 = vrot.slane %v877_v28, 2  ;;  %v860_v33 = vadd.f32 %v1043_v7, %v848_v29  ;;  %v869_v42 = vadd.f32 %v868_v39, %v867_v36 }
 0x243   :  { %v885_v34 = vsel %vm882_vm3, %v883_v31, %v884_v32  ;;  %875 = vst [vmem:[#allocation10 + $0x1e] sm:$0x3] %v860_v33  ;;  %v878_v35 = vmax.f32 %v860_v33, 0.0  ;;  %v870_v45 = vrot.slane %v869_v42, 1 }
 0x245   :  { %v886_v37 = vrot.slane %v878_v35, 2  ;;  %v871_v48 = vadd.f32 %v870_v45, %v869_v42 }
 0x247   :  { %v887_v38 = vsel %vm882_vm3, %v884_v32, %v886_v37 }
 0x248   :  { %v890_v40 = vadd.f32 %v887_v38, %v885_v34 }
 0x24a   :  { %v891_v41 = vrot.slane %v890_v40, 4 }
 0x24c   :  { %v892_v43 = vadd.f32 %v891_v41, %v890_v40 }
 0x24e   :  { %v893_v44 = vrot.slane %v892_v43, 2 }
 0x250   :  { %v894_v46 = vadd.f32 %v893_v44, %v892_v43 }
 0x252   :  { %v895_v47 = vrot.slane %v894_v46, 1 }
 0x254   :  { %v896_v49 = vadd.f32 %v895_v47, %v894_v46 }
 0x256   :  { %v898_v50 = vsel %vm897_vm4, %v871_v48, %v896_v49 }
 0x257   :  { %1431 = vmatmul.mubr.f32.vlgmr.msra.gmra.mrb[30].mxu0 %v898_v50 }
 0x258   :  { %1655 = shalt.err (!%p1652_p0)
}
 0x259   :  { %s1656_s26 = scalar_lea.hbm %s2011_s8, 512 }
 0x25a   :  { %p1657_p1 = scmp.ne.s32.totalorder %s2011_s8, %s1656_s26  ;;  %p1660_p2 = scmp.lt.u32.totalorder %s1656_s26, %s2011_s8 }
 0x25c   :  { %p1662_p3 = pnand %p1660_p2, %p1657_p1 }
 0x25e   :  { %1665 = shalt.err (!%p1662_p3)
}
 0x25f   :  { %1004 = dma.vmem_to_hbm [thread:$0]  %s999_s25, 512, %s2011_s8, [#allocation6], %s1698_s21, %s1698_s21, %s1699_s22  }
 0x260   :  { %v1044_v51 = vld [vmem:[%s2010_s7] ss:$0 sm:$0xff]  ;;  %s1706_s14 = smov [#allocation11]  }
 0x261   :  { %s1011_s15 = sshll.u32 %s1706_s14, 4  ;;  %s1012_s15 = int_to_ptr.vmem [resolvable:$true] %s1011_s15 }
 0x262   :  { %s1666_s16 = scalar_lea.vmem %s1012_s15, 32  ;;  %p1671_p5 = scmp.lt.s32.totalorder %s1012_s15, %s1012_s15 }
 0x263   :  { %p1667_p4 = scmp.ne.s32.totalorder %s1012_s15, %s1666_s16  ;;  %p1672_p6 = scmp.lt.s32.totalorder %s1666_s16, %s1666_s16 }
 0x265   :  { %p1673_p7 = por %p1672_p6, %p1671_p5 }
 0x267   :  { %p1674_p8 = pnand %p1673_p7, %p1667_p4 }
 0x32a   :  { %v988_v52 = vpop.f32.mrb[30].mxu0 }
 0x32b   :  { %v989_v53 = vadd.f32 %v1044_v51, %v988_v52  ;;  %v1432_v54 = vpop.f32.mrb[31].mxu0 }
 0x32d   :  { %992 = vst [vmem:[#allocation11] sm:$0x3] %v989_v53 }
 0x32e   :  { %1677 = shalt.err (!%p1674_p8)
}
 0x32f   :  { %s1678_s21 = scalar_lea.hbm %s2012_s9, 32 }
 0x330   :  { %p1679_p9 = scmp.ne.s32.totalorder %s2012_s9, %s1678_s21  ;;  %p1682_p10 = scmp.lt.u32.totalorder %s1678_s21, %s2012_s9 }
 0x332   :  { %p1684_p11 = pnand %p1682_p10, %p1679_p9 }
 0x334   :  { %1687 = shalt.err (!%p1684_p11)
}
 0x335   :  { %1014 = dma.vmem_to_hbm [thread:$0]  %s1012_s15, 32, %s2012_s9, [#allocation12]  }
 0x336   :  { %1692 = dma.done.wait [#allocation6], 512  }
 0x337   :  { %1693 = vsyncadd [#allocation6], 4294966784 }
 0x338   :  { %1694 = dma.done.wait [#allocation12], 32  }
 0x339   :  { %1695 = vsyncadd [#allocation12], 4294967264 }
 0x33a   :  { %1021 = vsyncpa [#allocation5], 1 }
 0x33b   :  { %1022 = vsyncpa [#allocation8], 1 }
 0x33c   :  { %1023 = vsyncpa [#allocation6], 1 }
 0x33d   :  { %1024 = vsyncpa [#allocation12], 1 }

</bundles_post_ra>
